<compile_context>
chip_gen: v7x
topology: tpu7x:2x2x1
jax: 0.10.0
libtpu: 0.0.40
codegen_flags: <defaults>
</compile_context>

<pallas_src>
import functools

import jax
import jax.numpy as jnp
from jax.experimental import pallas as pl
from jax.experimental.pallas import tpu as pltpu


_MAX_TH = 512          # default H tile (multiple of 128)
_DEFAULT_BLOCK_M = 256  # default batch tile (full MXU M pass on v6e/v7x)


def _round_up(x, m):
    return ((x + m - 1) // m) * m


def _cdiv(a, b):
    return -(-a // b)


def _device_vmem_bytes():
    """Physical VMEM per TensorCore; conservative 64 MiB (v7x) fallback."""
    try:
        return int(pltpu.get_tpu_info().vmem_capacity_bytes)
    except Exception:
        return 64 << 20


# --------------------------------------------------------------------------
# One-time parameter preparation (hoisted out of the jitted forward).
# --------------------------------------------------------------------------
def prepare_params(w1, b1, w2, b2, *, compute_dtype=jnp.bfloat16,
                   max_th=_MAX_TH):
    """Cast weights to the MXU dtype and zero-pad to tile-aligned shapes.

    Call this ONCE and reuse the result across forward calls; doing the cast
    and pad inside the per-step jit doubles the weight HBM traffic per call.
    Padding is with zeros, so the padded H columns / O columns contribute
    nothing and the forward result is unchanged.
    """
    D_in, H = w1.shape
    O = w2.shape[1]
    H_pad = H if H <= max_th else _round_up(H, max_th)
    O_pad = _round_up(O, 128)      # lane-dense output -> unmasked vst

    w1c = jnp.asarray(w1, compute_dtype)
    w2c = jnp.asarray(w2, compute_dtype)
    b1f = jnp.asarray(b1, jnp.float32).reshape(1, H)
    b2f = jnp.asarray(b2, jnp.float32).reshape(1, O)

    pad_h = H_pad - H
    pad_o = O_pad - O
    if pad_h:
        w1c = jnp.pad(w1c, ((0, 0), (0, pad_h)))
        b1f = jnp.pad(b1f, ((0, 0), (0, pad_h)))
    if pad_h or pad_o:
        w2c = jnp.pad(w2c, ((0, pad_h), (0, pad_o)))
    if pad_o:
        b2f = jnp.pad(b2f, ((0, 0), (0, pad_o)))
    return w1c, b1f, w2c, b2f


# --------------------------------------------------------------------------
# Static tile planning (runs at trace time on Python ints).
# --------------------------------------------------------------------------
def _plan_tiles(B, D_in, H_pad, O_pad, out_itemsize, block_m, max_th,
                vmem_cap):
    # ---- batch tile: minimise padding, keep MXU/sublane alignment --------
    n_m = max(1, _cdiv(B, block_m))
    # v7x has 2 TensorCores; give the "parallel" axis >=2 steps when there is
    # enough work to split (no-op / harmless on single-TC v5e & v6e).
    if n_m == 1 and B >= 256:
        n_m = 2
    tm0 = _cdiv(B, n_m)
    tm = _round_up(tm0, 8)
    for align in (256, 128):       # take big alignment only if padding <~10%
        cand = _round_up(tm0, align)
        if cand * n_m <= max(int(1.1 * B), B + 8):
            tm = cand
            break

    # ---- H tile -----------------------------------------------------------
    tH = H_pad if H_pad <= max_th else max_th

    # ---- shrink until the VMEM estimate fits the device budget -------------
    def est(tm_, th_):
        bf, f32 = 2, 4
        return (2 * tm_ * D_in * bf             # x tile (double-buffered)
                + 2 * D_in * th_ * bf           # w1 column block
                + 2 * th_ * f32                 # b1 block
                + 2 * th_ * O_pad * bf          # w2 row block
                + 2 * O_pad * f32               # b2
                + 2 * tm_ * O_pad * out_itemsize  # out tile
                + tm_ * O_pad * f32             # f32 accumulator scratch
                + tm_ * th_ * f32               # live f32 intermediate h
                + (4 << 20))                    # compiler scratch headroom

    while est(tm, tH) > vmem_cap:
        if tH > 128 and tH % 256 == 0 and H_pad % (tH // 2) == 0:
            tH //= 2
        elif tm > 8:
            tm = max(8, _round_up(tm // 2, 8))
        else:
            break

    n_m = _cdiv(B, tm)
    B_pad = n_m * tm
    n_k = H_pad // tH
    return tm, B_pad, n_m, tH, n_k, est(tm, tH)


# --------------------------------------------------------------------------
# Kernel
# --------------------------------------------------------------------------
def _mlp_kernel(x_ref, w1_ref, b1_ref, w2_ref, b2_ref, out_ref, acc_ref):
    k = pl.program_id(1)

    @pl.when(k == 0)
    def _():
        acc_ref[...] = jnp.zeros_like(acc_ref)

    # fc1 slice: (tm, D_in) @ (D_in, tH) on the MXU, f32 accumulation.
    h = jnp.dot(x_ref[...], w1_ref[...], preferred_element_type=jnp.float32)
    # Bias + ReLU in f32 on the VPU (v5e has no bf16 VPU).
    h = jnp.maximum(h + b1_ref[...], 0.0)
    # fc2 slice: (tm, tH) @ (tH, O_pad), accumulated into the f32 scratch.
    acc_ref[...] += jnp.dot(h.astype(w2_ref.dtype), w2_ref[...],
                            preferred_element_type=jnp.float32)

    @pl.when(k == pl.num_programs(1) - 1)
    def _():
        out_ref[...] = (acc_ref[...] + b2_ref[...]).astype(out_ref.dtype)


# --------------------------------------------------------------------------
# Forward wrapper
# --------------------------------------------------------------------------
@functools.partial(
    jax.jit,
    static_argnames=("ahead", "output_size", "block_m", "max_th", "out_dtype"))
def mlp_forward(x, w1c, b1f, w2c, b2f, *, ahead, output_size,
                block_m=_DEFAULT_BLOCK_M, max_th=_MAX_TH,
                out_dtype=jnp.float32):
    """x: (B, ...) flattened to (B, D_in) like torch's x.reshape(B, -1).

    w1c/b1f/w2c/b2f must come from prepare_params() (bf16, tile-padded).
    """
    B = x.shape[0]
    x2 = x.reshape(B, -1)
    D_in = x2.shape[1]
    H_pad = w1c.shape[1]
    O_pad = w2c.shape[1]
    O = output_size * ahead
    compute_dtype = w1c.dtype
    out_itemsize = jnp.dtype(out_dtype).itemsize

    vmem_cap = int(0.85 * _device_vmem_bytes())
    tm, B_pad, n_m, tH, n_k, vmem_est = _plan_tiles(
        B, D_in, H_pad, O_pad, out_itemsize, block_m, max_th, vmem_cap)

    # Activations: cast per call (they change every step), pad batch.
    xc = x2.astype(compute_dtype)
    if B_pad != B:
        xc = jnp.pad(xc, ((0, B_pad - B), (0, 0)))

    vmem_limit = int(min(max(vmem_est, 32 << 20), vmem_cap))

    cost = pl.CostEstimate(
        flops=2 * B_pad * (D_in * H_pad + H_pad * O_pad),
        transcendentals=0,
        bytes_accessed=(B_pad * D_in * 2
                        + n_m * (D_in * H_pad + H_pad * O_pad) * 2
                        + (H_pad + O_pad) * 4
                        + B_pad * O_pad * out_itemsize),
    )

    out = pl.pallas_call(
        _mlp_kernel,
        out_shape=jax.ShapeDtypeStruct((B_pad, O_pad), out_dtype),
        grid_spec=pltpu.PrefetchScalarGridSpec(
            num_scalar_prefetch=0,
            grid=(n_m, n_k),                                   # k (reduction) last
            in_specs=[
                pl.BlockSpec((tm, D_in), lambda i, k: (i, 0)),   # x: reused over k
                pl.BlockSpec((D_in, tH), lambda i, k: (0, k)),   # w1 column block
                pl.BlockSpec((1, tH), lambda i, k: (0, k)),      # b1 block
                pl.BlockSpec((tH, O_pad), lambda i, k: (k, 0)),  # w2 row block
                pl.BlockSpec((1, O_pad), lambda i, k: (0, 0)),   # b2 (constant)
            ],
            out_specs=pl.BlockSpec((tm, O_pad), lambda i, k: (i, 0)),
            scratch_shapes=[pltpu.VMEM((tm, O_pad), jnp.float32)],
        ),
        compiler_params=pltpu.CompilerParams(
            dimension_semantics=("parallel", "arbitrary"),
            vmem_limit_bytes=vmem_limit,
        ),
        cost_estimate=cost,
    )(xc, w1c, b1f, w2c, b2f)

    # Strip batch/lane padding, then the equivalent of .view(-1, ahead, out).
    out = out[:B, :O]
    return out.reshape(-1, ahead, output_size)


def init_params(key, input_size, hidden_size, output_size, ahead,
                dtype=jnp.float32):
    """Deterministic init mimicking nn.Linear's U(-1/sqrt(fan_in), 1/sqrt(fan_in))."""
    k1, k2, k3, k4 = jax.random.split(key, 4)
    lim1 = 1.0 / (input_size ** 0.5)
    lim2 = 1.0 / (hidden_size ** 0.5)
    out_dim = output_size * ahead
    # Stored transposed relative to torch (fan_in, fan_out) so kernel does x @ W.
    w1 = jax.random.uniform(k1, (input_size, hidden_size), dtype, -lim1, lim1)
    b1 = jax.random.uniform(k2, (1, hidden_size), dtype, -lim1, lim1)
    w2 = jax.random.uniform(k3, (hidden_size, out_dim), dtype, -lim2, lim2)
    b2 = jax.random.uniform(k4, (1, out_dim), dtype, -lim2, lim2)
    return w1, b1, w2, b2


if __name__ == "__main__":
    key = jax.random.PRNGKey(0)
    kx, kp = jax.random.split(key)

    # Small shapes consistent with the module: x of shape (B, seq, feat)
    # -> flattened input_size = seq * feat.
    B, seq, feat = 2, 8, 4
    input_size = seq * feat          # 32
    hidden_size = 32
    output_size = 4
    ahead = 2

    x = jax.random.normal(kx, (B, seq, feat), dtype=jnp.float32)
    w1, b1, w2, b2 = init_params(kp, input_size, hidden_size, output_size, ahead)

    # One-time weight prep (hoisted out of the per-call jitted forward).
    w1c, b1f, w2c, b2f = prepare_params(w1, b1, w2, b2)

    y = mlp_forward(x, w1c, b1f, w2c, b2f, ahead=ahead, output_size=output_size)
    jax.block_until_ready(y)
    assert y.shape == (B, ahead, output_size)

    # Reference 1: bf16-operand / f32-accumulate path matching the kernel.
    x2 = x.reshape(B, -1)
    h = jnp.dot(x2.astype(jnp.bfloat16), w1.astype(jnp.bfloat16),
                preferred_element_type=jnp.float32) + b1.reshape(1, -1)
    h = jnp.maximum(h, 0.0)
    ref_bf16 = (jnp.dot(h.astype(jnp.bfloat16), w2.astype(jnp.bfloat16),
                        preferred_element_type=jnp.float32)
                + b2.reshape(1, -1)).reshape(-1, ahead, output_size)
    assert jnp.allclose(y, ref_bf16, atol=2e-3, rtol=2e-3)

    # Reference 2: pure-f32 PyTorch-equivalent forward (loose bf16 tolerance).
    ref_f32 = (jnp.maximum(x2 @ w1 + b1.reshape(1, -1), 0.0) @ w2
               + b2.reshape(1, -1)).reshape(-1, ahead, output_size)
    assert jnp.allclose(y, ref_f32, atol=5e-2, rtol=5e-2)

    print("KERNEL_OK")
</pallas_src>

<mosaic_0001>
module attributes {stable_mosaic.version = 11 : i64} {
  func.func @_mlp_kernel(%arg0: i32, %arg1: i32, %arg2: memref<8x32xbf16, #tpu.memory_space<vmem>>, %arg3: memref<32x32xbf16, #tpu.memory_space<vmem>>, %arg4: memref<1x32xf32, #tpu.memory_space<vmem>>, %arg5: memref<32x128xbf16, #tpu.memory_space<vmem>>, %arg6: memref<1x128xf32, #tpu.memory_space<vmem>>, %arg7: memref<8x128xf32, #tpu.memory_space<vmem>>, %arg8: memref<8x128xf32, #tpu.memory_space<vmem>>) attributes {dimension_semantics = [#tpu.dimension_semantics<parallel>, #tpu.dimension_semantics<arbitrary>], iteration_bounds = array<i64: 1, 1>, scalar_prefetch = 0 : i64, scratch_operands = 1 : i64, tpu.core_type = #tpu.core_type<tc>, window_params = [{transform_indices = @transform_0, window_bounds = array<i64: 8, 32>}, {transform_indices = @transform_1, window_bounds = array<i64: 32, 32>}, {transform_indices = @transform_2, window_bounds = array<i64: 1, 32>}, {transform_indices = @transform_3, window_bounds = array<i64: 32, 128>}, {pipeline_mode = #tpu.pipeline_mode<synchronous>, transform_indices = @transform_4, window_bounds = array<i64: 1, 128>}, {transform_indices = @transform_5, window_bounds = array<i64: 8, 128>}]} {
    %c0_i32 = arith.constant 0 : i32
    %0 = arith.cmpi eq, %arg1, %c0_i32 : i32
    %1 = arith.extui %0 : i1 to i32
    %c0_i32_0 = arith.constant 0 : i32
    %2 = arith.cmpi ne, %1, %c0_i32_0 : i32
    scf.if %2 {
      %cst_16 = arith.constant 0.000000e+00 : f32
      %20 = vector.broadcast %cst_16 : f32 to vector<8x128xf32>
      %c0_17 = arith.constant 0 : index
      %c0_18 = arith.constant 0 : index
      %21 = vector.load %arg8[%c0_17, %c0_18] : memref<8x128xf32, #tpu.memory_space<vmem>>, vector<8x128xf32>
      tpu.vector_store %arg8[%c0_17, %c0_18], %20 {strides = array<i32>} : memref<8x128xf32, #tpu.memory_space<vmem>>, vector<8x128xf32>,
    } else {
    }
    %c0 = arith.constant 0 : index
    %c0_1 = arith.constant 0 : index
    %3 = vector.load %arg2[%c0, %c0_1] : memref<8x32xbf16, #tpu.memory_space<vmem>>, vector<8x32xbf16>
    %c0_2 = arith.constant 0 : index
    %c0_3 = arith.constant 0 : index
    %4 = vector.load %arg3[%c0_2, %c0_3] : memref<32x32xbf16, #tpu.memory_space<vmem>>, vector<32x32xbf16>
    %cst = arith.constant dense<0.000000e+00> : vector<8x32xf32>
    %5 = tpu.matmul %3, %4, %cst {dimension_numbers = #tpu.dot_dimension_numbers<[1], [0], [0], [1], [0, 0, 1, 1], [], []>} : vector<8x32xbf16>, vector<32x32xbf16>, vector<8x32xf32> -> vector<8x32xf32>
    %c0_4 = arith.constant 0 : index
    %c0_5 = arith.constant 0 : index
    %6 = vector.load %arg4[%c0_4, %c0_5] : memref<1x32xf32, #tpu.memory_space<vmem>>, vector<1x32xf32>
    %7 = vector.broadcast %6 : vector<1x32xf32> to vector<8x32xf32>
    %8 = arith.addf %5, %7 : vector<8x32xf32>
    %cst_6 = arith.constant 0.000000e+00 : f32
    %9 = vector.broadcast %cst_6 : f32 to vector<8x32xf32>
    %10 = arith.maximumf %8, %9 : vector<8x32xf32>
    %c0_7 = arith.constant 0 : index
    %c0_8 = arith.constant 0 : index
    %11 = vector.load %arg8[%c0_7, %c0_8] : memref<8x128xf32, #tpu.memory_space<vmem>>, vector<8x128xf32>
    %12 = arith.truncf %10 : vector<8x32xf32> to vector<8x32xbf16>
    %c0_9 = arith.constant 0 : index
    %c0_10 = arith.constant 0 : index
    %13 = vector.load %arg5[%c0_9, %c0_10] : memref<32x128xbf16, #tpu.memory_space<vmem>>, vector<32x128xbf16>
    %cst_11 = arith.constant dense<0.000000e+00> : vector<8x128xf32>
    %14 = tpu.matmul %12, %13, %cst_11 {dimension_numbers = #tpu.dot_dimension_numbers<[1], [0], [0], [1], [0, 0, 1, 1], [], []>} : vector<8x32xbf16>, vector<32x128xbf16>, vector<8x128xf32> -> vector<8x128xf32>
    %15 = arith.addf %11, %14 : vector<8x128xf32>
    %c0_12 = arith.constant 0 : index
    %c0_13 = arith.constant 0 : index
    %16 = vector.load %arg8[%c0_12, %c0_13] : memref<8x128xf32, #tpu.memory_space<vmem>>, vector<8x128xf32>
    tpu.vector_store %arg8[%c0_12, %c0_13], %15 {strides = array<i32>} : memref<8x128xf32, #tpu.memory_space<vmem>>, vector<8x128xf32>,
    %c0_i32_14 = arith.constant 0 : i32
    %17 = arith.cmpi eq, %arg1, %c0_i32_14 : i32
    %18 = arith.extui %17 : i1 to i32
    %c0_i32_15 = arith.constant 0 : i32
    %19 = arith.cmpi ne, %18, %c0_i32_15 : i32
    scf.if %19 {
      %c0_16 = arith.constant 0 : index
      %c0_17 = arith.constant 0 : index
      %20 = vector.load %arg8[%c0_16, %c0_17] : memref<8x128xf32, #tpu.memory_space<vmem>>, vector<8x128xf32>
      %c0_18 = arith.constant 0 : index
      %c0_19 = arith.constant 0 : index
      %21 = vector.load %arg6[%c0_18, %c0_19] : memref<1x128xf32, #tpu.memory_space<vmem>>, vector<1x128xf32>
      %22 = vector.broadcast %21 : vector<1x128xf32> to vector<8x128xf32>
      %23 = arith.addf %20, %22 : vector<8x128xf32>
      %c0_20 = arith.constant 0 : index
      %c0_21 = arith.constant 0 : index
      %24 = vector.load %arg7[%c0_20, %c0_21] : memref<8x128xf32, #tpu.memory_space<vmem>>, vector<8x128xf32>
      tpu.vector_store %arg7[%c0_20, %c0_21], %23 {strides = array<i32>} : memref<8x128xf32, #tpu.memory_space<vmem>>, vector<8x128xf32>,
    } else {
    }
    return
  }
  func.func @transform_0(%arg0: i32, %arg1: i32) -> (i32, i32) {
    %c0_i32 = arith.constant 0 : i32
    %c0_i32_0 = arith.constant 0 : i32
    return %arg0, %c0_i32 : i32, i32
  }
  func.func @transform_1(%arg0: i32, %arg1: i32) -> (i32, i32) {
    %c0_i32 = arith.constant 0 : i32
    %c0_i32_0 = arith.constant 0 : i32
    return %c0_i32, %arg1 : i32, i32
  }
  func.func @transform_2(%arg0: i32, %arg1: i32) -> (i32, i32) {
    %c0_i32 = arith.constant 0 : i32
    %c0_i32_0 = arith.constant 0 : i32
    return %c0_i32, %arg1 : i32, i32
  }
  func.func @transform_3(%arg0: i32, %arg1: i32) -> (i32, i32) {
    %c0_i32 = arith.constant 0 : i32
    %c0_i32_0 = arith.constant 0 : i32
    return %arg1, %c0_i32 : i32, i32
  }
  func.func @transform_4(%arg0: i32, %arg1: i32) -> (i32, i32) {
    %c0_i32 = arith.constant 0 : i32
    %c0_i32_0 = arith.constant 0 : i32
    %c0_i32_1 = arith.constant 0 : i32
    return %c0_i32, %c0_i32_0 : i32, i32
  }
  func.func @transform_5(%arg0: i32, %arg1: i32) -> (i32, i32) {
    %c0_i32 = arith.constant 0 : i32
    %c0_i32_0 = arith.constant 0 : i32
    return %arg0, %c0_i32 : i32, i32
  }
}

</mosaic_0001>

<bundles_post_ra>
// kernel: mlp_forward.1
= control target key start
LH: loop header
LB: loop body
LE: loop exit
PB: predicated region body
PF: predicated region fallthrough
CT: control target
= control target key end

     0   :  { %v211_v0 = vmov 0.0   ;;  %vm212_vm0 = vmmov 0   ;;  %vm50_vm1 = vcmask 261120   ;;  %s269_s1 = inlined_call_operand.vmem [shape: bf16[32,32], index: 1, kind: input, shape index: {}]   ;;  %s270_s0 = inlined_call_operand.vmem [shape: bf16[8,32], index: 0, kind: input, shape index: {}]   ;;  %s271_s3 = inlined_call_operand.vmem [shape: bf16[32,128], index: 3, kind: input, shape index: {}]   ;;  %s272_s2 = inlined_call_operand.vmem [shape: f32[1,32], index: 2, kind: input, shape index: {}]   ;;  %s273_s4 = inlined_call_operand.vmem [shape: f32[1,128], index: 4, kind: input, shape index: {}]   ;;  %s274_s5 = inlined_call_operand.vmem [shape: f32[8,128], index: 5, kind: output, shape index: {}]  }
   0x1   :  { %189 = vmatprep.subr.bf16.mxu0 %v211_v0  ;;  %v207_v1 = vld [vmem:[%s269_s1] sm:$0xff]   ;;  %193 = vmatprep.mubr.msk.bf16.mxu0 %vm212_vm0, %v211_v0  ;;  %v208_v2 = vld [vmem:[%s269_s1 + $0x8] sm:$0xff]  }
   0x2   :  { %197 = vmatprep.subr.bf16.mxu1 %v211_v0  ;;  %201 = vmatprep.mubr.msk.bf16.mxu1 %vm212_vm0, %v211_v0  ;;  %v26_v3 = vld [vmem:[%s270_s0] sm:$0xf]  ;;  %v210_v5 = vld [vmem:[%s271_s3 + $0x8] sm:$0xff]  }
   0x3   :  { %190 = vmatpush3.bf16.msra.mxu0 %v207_v1  ;;  %v209_v4 = vld [vmem:[%s271_s3] sm:$0xff]  }
   0x4   :  { %191 = vmatprep.subr.bf16.mxu0 %v211_v0  ;;  %198 = vmatpush3.bf16.msra.mxu1 %v209_v4  ;;  %v175_v6 = vld [vmem:[%s272_s2] ss:$0 sm:$0xff] }
   0x5   :  { %199 = vmatprep.subr.bf16.mxu1 %v211_v0  ;;  %v182_v14 = vld [vmem:[%s273_s4] ss:$0 sm:$0xff] }
   0x7   :  { %192 = vmatpush3.bf16.msra.mxu0 %v208_v2 }
   0x8   :  { %200 = vmatpush3.bf16.msra.mxu1 %v210_v5 }
   0xa   :  { %194 = vmatmul.mubr.msk.bf16.vlgmr.msra.gmra.mrb[0].mxu0 %vm50_vm1, %v26_v3 }
  0xdd   :  { %v88_v7 = vpop.f32.mrb[0].mxu0 }
  0xde   :  { %v89_v8 = vadd.f32 %v175_v6, %v88_v7  ;;  %v195_v9 = vpop.f32.mrb[1].mxu0 }
  0xdf   :  { %v91_v10 = vpop.f32.mrb[2].mxu0 }
  0xe0   :  { %v94_v11 = vmax.f32 %v89_v8, 0.0  ;;  %v196_v12 = vpop.f32.mrb[3].mxu0 }
  0xe2   :  { %v96_v13 = vpack.c.bf16 %v94_v11, %v94_v11 }
  0xe4   :  { %202 = vmatmul.mubr.msk.bf16.vlgmr.msra.gmra.mrb[0].mxu1 %vm50_vm1, %v96_v13 }
 0x1b7   :  { %v150_v15 = vpop.f32.mrb[0].mxu1 }
 0x1b8   :  { %v169_v16 = vadd.f32 %v182_v14, %v150_v15  ;;  %v203_v17 = vpop.f32.mrb[1].mxu1 }
 0x1b9   :  { %v153_v18 = vpop.f32.mrb[2].mxu1 }
 0x1ba   :  { %170 = vst [vmem:[%s274_s5] sm:$0xff] %v169_v16  ;;  %v204_v19 = vpop.f32.mrb[3].mxu1 }

</bundles_post_ra>
